<compile_context>
chip_gen: v5e
topology: v5e:2x2
jax: 0.10.0
libtpu: 0.0.40
codegen_flags: <defaults>
</compile_context>

<pallas_src>
import functools

import jax
import jax.numpy as jnp
from jax import lax
from jax.experimental import pallas as pl
from jax.experimental.pallas import tpu as pltpu


# ----------------------------------------------------------------------------
# Packed (lane-dense) kernel:  outputs [N, C] viewed as [Np, 128]
# ----------------------------------------------------------------------------

def _elbo_packed_kernel(logp_ref, sel_ref, out_ref, acc_ref, *,
                        n_packed_rows, num_classes, rows_per_packed,
                        tile_rows, tiles_q, tiles_rem, total_tiles, has_edge):
    p = pl.program_id(0)           # parallel chunk (one per TensorCore on v7x)
    t = pl.program_id(1)           # reduction step within the chunk

    # Per-chunk tile range; the remainder is spread over the leading chunks so
    # at most one no-op (compute-skipped, no-re-DMA) step exists per chunk.
    start_p = p * tiles_q + jnp.minimum(p, tiles_rem)
    count_p = tiles_q + jnp.where(p < tiles_rem, 1, 0)
    valid = t < count_p
    tile_idx = start_p + jnp.minimum(t, count_p - 1)

    @pl.when(t == 0)
    def _():
        acc_ref[...] = jnp.zeros_like(acc_ref)

    tn = logp_ref.shape[0]
    r = rows_per_packed
    c = num_classes

    def accumulate(apply_row_mask):
        logp = logp_ref[...]                                     # [tn, 128] native
        sel = sel_ref[...]                                       # [tn, r]  f32

        # Expand each original row's picked-lane id across its C lanes with a
        # tiny MXU matmul: expand[r, l] = 1 iff l // C == r.
        rr = lax.broadcasted_iota(jnp.int32, (r, 128), 0)
        ll = lax.broadcasted_iota(jnp.int32, (r, 128), 1)
        expand = (ll // c == rr).astype(jnp.float32)             # [r, 128]
        sel_lanes = jnp.dot(sel, expand,
                            preferred_element_type=jnp.float32)  # [tn, 128]

        lane = lax.broadcasted_iota(jnp.int32, (tn, 128), 1).astype(jnp.float32)
        mask = sel_lanes == lane
        if apply_row_mask:
            row = (lax.broadcasted_iota(jnp.int32, (tn, 128), 0)
                   + tile_idx * tile_rows)
            mask = mask & (row < n_packed_rows)

        # Select in the native dtype, upcast only for the reduction.
        picked = jnp.where(mask, logp, jnp.zeros((), logp.dtype))
        picked = picked.astype(jnp.float32)
        if tn % 8 == 0:
            # Pure vreg adds: collapse 8-row sublane groups into the scratch.
            acc_ref[...] += jnp.sum(picked.reshape(tn // 8, 8, 128), axis=0)
        else:
            acc_ref[0:1, :] += jnp.sum(picked, axis=0, keepdims=True)

    if has_edge:
        is_edge = tile_idx == (total_tiles - 1)

        @pl.when(valid & jnp.logical_not(is_edge))
        def _():
            accumulate(False)          # interior tiles: no row mask

        @pl.when(valid & is_edge)
        def _():
            accumulate(True)           # edge tile: mask packed rows >= Np
    else:
        @pl.when(valid)
        def _():
            accumulate(False)

    @pl.when(t == pl.num_programs(1) - 1)
    def _():
        # Single cross-lane collapse per chunk.
        out_ref[...] = jnp.sum(acc_ref[...], keepdims=True)


def _pick_packed_tile_rows(np_rows, itemsize, vmem_budget_bytes):
    if np_rows <= 1024:
        return np_rows
    # Padded VMEM per packed row: 128-lane logp row + lane-padded f32 sel row,
    # x2 for double buffering.
    per_row = 2 * (128 * itemsize + 512)
    sub = max(8, 32 // itemsize)           # sublane packing multiple per dtype
    t = (vmem_budget_bytes // per_row) // sub * sub
    return max(sub, min(t, np_rows))


def _sum_target_logprobs_packed(outputs, targets, *, parallel_chunks, tile_rows,
                                vmem_budget_bytes):
    n, c = outputs.shape
    r = 128 // c
    itemsize = jnp.dtype(outputs.dtype).itemsize

    # Pad N up to a multiple of 128//C so the lane-dense reshape is exact.
    # (Only copies when N % (128//C) != 0; padded rows are 0.0 -> contribute 0.)
    n_pad = pl.cdiv(n, r) * r
    tgt = targets.astype(jnp.int32)
    if n_pad != n:
        outputs = jnp.pad(outputs, ((0, n_pad - n), (0, 0)))
        tgt = jnp.pad(tgt, (0, n_pad - n))
    np_rows = n_pad // r

    packed = outputs.reshape(np_rows, 128)   # contiguous row-major: cheap view
    # Picked lane within each 128-wide packed row: (i % R) * C + tgt[i].
    sel = (jnp.arange(n_pad, dtype=jnp.int32) % r) * c + tgt
    sel = sel.astype(jnp.float32).reshape(np_rows, r)

    if tile_rows is None:
        tile_rows = _pick_packed_tile_rows(np_rows, itemsize, vmem_budget_bytes)
    tile_rows = min(tile_rows, np_rows)

    total_tiles = pl.cdiv(np_rows, tile_rows)
    p_chunks = max(1, min(parallel_chunks, total_tiles))
    tiles_q, tiles_rem = divmod(total_tiles, p_chunks)
    steps = tiles_q + (1 if tiles_rem else 0)
    has_edge = (np_rows % tile_rows) != 0

    def tile_map(pi, ti):
        start = pi * tiles_q + jnp.minimum(pi, tiles_rem)
        count = tiles_q + jnp.where(pi < tiles_rem, 1, 0)
        # Overflow steps repeat the previous block index -> no redundant DMA.
        return (start + jnp.minimum(ti, count - 1), 0)

    kernel = functools.partial(
        _elbo_packed_kernel,
        n_packed_rows=np_rows, num_classes=c, rows_per_packed=r,
        tile_rows=tile_rows, tiles_q=tiles_q, tiles_rem=tiles_rem,
        total_tiles=total_tiles, has_edge=has_edge)

    cost = pl.CostEstimate(
        flops=8 * np_rows * 128,
        transcendentals=0,
        bytes_accessed=np_rows * 128 * itemsize + np_rows * r * 4 + p_chunks * 4)

    partials = pl.pallas_call(
        kernel,
        out_shape=jax.ShapeDtypeStruct((p_chunks, 1, 1), jnp.float32),
        grid=(p_chunks, steps),
        in_specs=[
            pl.BlockSpec((tile_rows, 128), tile_map),   # lane-dense log-probs
            pl.BlockSpec((tile_rows, r), tile_map),     # picked-lane ids (f32)
        ],
        out_specs=pl.BlockSpec((None, 1, 1), lambda pi, ti: (pi, 0, 0)),
        scratch_shapes=[pltpu.VMEM((8, 128), jnp.float32)],
        compiler_params=pltpu.CompilerParams(
            dimension_semantics=("parallel", "arbitrary"),
            vmem_limit_bytes=32 * 1024 * 1024),
        cost_estimate=cost,
    )(packed, sel)
    return jnp.sum(partials)


# ----------------------------------------------------------------------------
# Fallback kernel (C does not divide 128, or tiny inputs): row-tiled layout.
# ----------------------------------------------------------------------------

def _elbo_rows_kernel(logp_ref, tgt_ref, out_ref, *, n_rows, tile_rows):
    t = pl.program_id(0)

    @pl.when(t == 0)
    def _():
        out_ref[...] = jnp.zeros_like(out_ref)

    logp = logp_ref[...]                       # [tn, C] native dtype
    tgt = tgt_ref[...]                         # [tn, 1] int32
    tn, c = logp_ref.shape
    col = lax.broadcasted_iota(jnp.int32, (tn, c), 1)
    row = lax.broadcasted_iota(jnp.int32, (tn, c), 0) + t * tile_rows
    mask = (col == tgt) & (row < n_rows)
    picked = jnp.where(mask, logp.astype(jnp.float32), jnp.float32(0.0))
    col_sum = jnp.sum(picked, axis=1, keepdims=True)
    out_ref[...] += jnp.sum(col_sum, axis=0, keepdims=True)


def _sum_target_logprobs_rows(outputs, targets, *, tile_rows, vmem_budget_bytes):
    n, c = outputs.shape
    itemsize = jnp.dtype(outputs.dtype).itemsize
    tgt2d = targets.astype(jnp.int32).reshape(n, 1)

    if tile_rows is None:
        sub = max(8, 32 // itemsize)
        # Padded VMEM per row (lane padding!) x2 for double buffering.
        per_row = 2 * (pl.cdiv(c, 128) * 128 * itemsize + 512)
        tile_rows = max(sub, (vmem_budget_bytes // per_row) // sub * sub)
    if tile_rows >= n:
        tile_rows = n

    kernel = functools.partial(_elbo_rows_kernel, n_rows=n, tile_rows=tile_rows)
    total = pl.pallas_call(
        kernel,
        out_shape=jax.ShapeDtypeStruct((1, 1), jnp.float32),
        grid=(pl.cdiv(n, tile_rows),),
        in_specs=[
            pl.BlockSpec((tile_rows, c), lambda t: (t, 0)),
            pl.BlockSpec((tile_rows, 1), lambda t: (t, 0)),
        ],
        out_specs=pl.BlockSpec((1, 1), lambda t: (0, 0)),
        compiler_params=pltpu.CompilerParams(
            dimension_semantics=("arbitrary",),
            vmem_limit_bytes=32 * 1024 * 1024),
    )(outputs, tgt2d)
    return total[0, 0]


# ----------------------------------------------------------------------------
# Public wrapper: EvidenceLowerBoundLoss.forward
# ----------------------------------------------------------------------------

def elbo_loss(outputs, targets, kl, num_params, *, parallel_chunks=1,
              tile_rows=None, vmem_budget_bytes=12 * 1024 * 1024):
    """nll_loss(outputs, targets, 'mean') + 0.1 * kl / num_params."""
    n, c = outputs.shape
    use_packed = (c <= 128) and (128 % c == 0) and (n * c >= 2048)
    if use_packed:
        total_logp = _sum_target_logprobs_packed(
            outputs, targets, parallel_chunks=parallel_chunks,
            tile_rows=tile_rows, vmem_budget_bytes=vmem_budget_bytes)
    else:
        total_logp = _sum_target_logprobs_rows(
            outputs, targets, tile_rows=tile_rows,
            vmem_budget_bytes=vmem_budget_bytes)

    nll_mean = -total_logp / jnp.float32(n)
    kl_term = (jnp.float32(0.1) * jnp.asarray(kl, jnp.float32)
               / jnp.float32(num_params))
    return nll_mean + kl_term


def _reference(outputs, targets, kl, num_params):
    n = outputs.shape[0]
    gathered = outputs[jnp.arange(n), targets].astype(jnp.float32)
    return -jnp.mean(gathered) + 0.1 * jnp.asarray(kl, jnp.float32) / num_params


if __name__ == "__main__":
    key = jax.random.PRNGKey(0)
    k1, k2, k3, k4, k5, k6, k7, k8 = jax.random.split(key, 8)

    # Synthetic "model" used only for its parameter count (as in __init__):
    # a single Linear(in=32, out=16) with bias -> 32*16 + 16 = 528 params.
    num_params = 32 * 16 + 16

    # --- Case 1: tiny f32 batch -> fallback row-tiled kernel. ---------------
    N1, C1 = 8, 16
    outputs1 = jax.nn.log_softmax(
        jax.random.normal(k1, (N1, C1), dtype=jnp.float32), axis=-1)
    targets1 = jax.random.randint(k2, (N1,), 0, C1, dtype=jnp.int32)
    kl1 = jnp.abs(jax.random.normal(k3, (), dtype=jnp.float32)) * 10.0
    loss1 = jax.block_until_ready(elbo_loss(outputs1, targets1, kl1, num_params))
    ref1 = _reference(outputs1, targets1, kl1, num_params)
    assert jnp.allclose(loss1, ref1, rtol=1e-5, atol=1e-5), (loss1, ref1)

    # --- Case 2: bf16 ragged batch -> packed kernel, multi-tile, edge mask,
    #     N-padding, and 2 parallel chunks (v7x-style split). ----------------
    N2, C2 = 203, 16
    outputs2 = jax.nn.log_softmax(
        jax.random.normal(k4, (N2, C2), dtype=jnp.float32), axis=-1
    ).astype(jnp.bfloat16)
    targets2 = jax.random.randint(k5, (N2,), 0, C2, dtype=jnp.int32)
    kl2 = jnp.float32(3.7)
    loss2 = jax.block_until_ready(
        elbo_loss(outputs2, targets2, kl2, num_params,
                  parallel_chunks=2, tile_rows=16))
    ref2 = _reference(outputs2, targets2, kl2, num_params)
    assert jnp.allclose(loss2, ref2, rtol=1e-4, atol=1e-4), (loss2, ref2)

    # --- Case 3: C that does not divide 128 -> fallback kernel. -------------
    N3, C3 = 40, 24
    outputs3 = jax.nn.log_softmax(
        jax.random.normal(k6, (N3, C3), dtype=jnp.float32), axis=-1)
    targets3 = jax.random.randint(k7, (N3,), 0, C3, dtype=jnp.int32)
    kl3 = jnp.float32(1.25)
    loss3 = jax.block_until_ready(elbo_loss(outputs3, targets3, kl3, num_params))
    ref3 = _reference(outputs3, targets3, kl3, num_params)
    assert jnp.allclose(loss3, ref3, rtol=1e-5, atol=1e-5), (loss3, ref3)

    # --- Case 4: f32, default auto-tiling on the packed path. ---------------
    N4, C4 = 4096, 16
    outputs4 = jax.nn.log_softmax(
        jax.random.normal(k8, (N4, C4), dtype=jnp.float32), axis=-1)
    targets4 = jax.random.randint(k2, (N4,), 0, C4, dtype=jnp.int32)
    kl4 = jnp.float32(0.5)
    loss4 = jax.block_until_ready(elbo_loss(outputs4, targets4, kl4, num_params))
    ref4 = _reference(outputs4, targets4, kl4, num_params)
    assert jnp.allclose(loss4, ref4, rtol=1e-5, atol=1e-5), (loss4, ref4)

    print("KERNEL_OK")
</pallas_src>

<mosaic_0001>
module attributes {stable_mosaic.version = 11 : i64} {
  func.func @_elbo_rows_kernel(%arg0: i32, %arg1: memref<8x16xf32, #tpu.memory_space<vmem>>, %arg2: memref<8x1xi32, #tpu.memory_space<vmem>>, %arg3: memref<1x1xf32, #tpu.memory_space<vmem>>) attributes {dimension_semantics = [#tpu.dimension_semantics<arbitrary>], iteration_bounds = array<i64: 1>, scalar_prefetch = 0 : i64, scratch_operands = 0 : i64, tpu.core_type = #tpu.core_type<tc>, window_params = [{transform_indices = @transform_0, window_bounds = array<i64: 8, 16>}, {transform_indices = @transform_1, window_bounds = array<i64: 8, 1>}, {pipeline_mode = #tpu.pipeline_mode<synchronous>, transform_indices = @transform_2, window_bounds = array<i64: 1, 1>}]} {
    %c0_i32 = arith.constant 0 : i32
    %0 = arith.cmpi eq, %arg0, %c0_i32 : i32
    %1 = arith.extui %0 : i1 to i32
    %c0_i32_0 = arith.constant 0 : i32
    %2 = arith.cmpi ne, %1, %c0_i32_0 : i32
    scf.if %2 {
      %cst_11 = arith.constant 0.000000e+00 : f32
      %24 = vector.broadcast %cst_11 : f32 to vector<1x1xf32>
      %c0_12 = arith.constant 0 : index
      %c0_13 = arith.constant 0 : index
      %25 = vector.load %arg3[%c0_12, %c0_13] : memref<1x1xf32, #tpu.memory_space<vmem>>, vector<1x1xf32>
      tpu.vector_store %arg3[%c0_12, %c0_13], %24 {strides = array<i32>} : memref<1x1xf32, #tpu.memory_space<vmem>>, vector<1x1xf32>,
    } else {
    }
    %c0 = arith.constant 0 : index
    %c0_1 = arith.constant 0 : index
    %3 = vector.load %arg1[%c0, %c0_1] : memref<8x16xf32, #tpu.memory_space<vmem>>, vector<8x16xf32>
    %c0_2 = arith.constant 0 : index
    %c0_3 = arith.constant 0 : index
    %4 = vector.load %arg2[%c0_2, %c0_3] : memref<8x1xi32, #tpu.memory_space<vmem>>, vector<8x1xi32>
    %5 = tpu.iota {dimensions = array<i32: 1>} : vector<8x16xi32>
    %6 = tpu.iota {dimensions = array<i32: 0>} : vector<8x16xi32>
    %c8_i32 = arith.constant 8 : i32
    %7 = arith.muli %arg0, %c8_i32 : i32
    %8 = vector.broadcast %7 : i32 to vector<8x16xi32>
    %9 = arith.addi %6, %8 : vector<8x16xi32>
    %10 = vector.broadcast %4 : vector<8x1xi32> to vector<8x16xi32>
    %11 = arith.cmpi eq, %5, %10 : vector<8x16xi32>
    %c8_i32_4 = arith.constant 8 : i32
    %12 = vector.broadcast %c8_i32_4 : i32 to vector<8x16xi32>
    %13 = arith.cmpi slt, %9, %12 : vector<8x16xi32>
    %14 = arith.andi %11, %13 : vector<8x16xi1>
    %cst = arith.constant 0.000000e+00 : f32
    %15 = vector.broadcast %cst : f32 to vector<8x16xf32>
    %16 = arith.select %14, %3, %15 : vector<8x16xi1>, vector<8x16xf32>
    %cst_5 = arith.constant dense<0.000000e+00> : vector<8xf32>
    %17 = vector.multi_reduction <add>, %16, %cst_5 [1] : vector<8x16xf32> to vector<8xf32>
    %18 = vector.shape_cast %17 : vector<8xf32> to vector<8x1xf32>
    %c0_6 = arith.constant 0 : index
    %c0_7 = arith.constant 0 : index
    %19 = vector.load %arg3[%c0_6, %c0_7] : memref<1x1xf32, #tpu.memory_space<vmem>>, vector<1x1xf32>
    %cst_8 = arith.constant dense<0.000000e+00> : vector<1xf32>
    %20 = vector.multi_reduction <add>, %18, %cst_8 [0] : vector<8x1xf32> to vector<1xf32>
    %21 = vector.shape_cast %20 : vector<1xf32> to vector<1x1xf32>
    %22 = arith.addf %19, %21 : vector<1x1xf32>
    %c0_9 = arith.constant 0 : index
    %c0_10 = arith.constant 0 : index
    %23 = vector.load %arg3[%c0_9, %c0_10] : memref<1x1xf32, #tpu.memory_space<vmem>>, vector<1x1xf32>
    tpu.vector_store %arg3[%c0_9, %c0_10], %22 {strides = array<i32>} : memref<1x1xf32, #tpu.memory_space<vmem>>, vector<1x1xf32>,
    return
  }
  func.func @transform_0(%arg0: i32) -> (i32, i32) {
    %c0_i32 = arith.constant 0 : i32
    %c0_i32_0 = arith.constant 0 : i32
    return %arg0, %c0_i32 : i32, i32
  }
  func.func @transform_1(%arg0: i32) -> (i32, i32) {
    %c0_i32 = arith.constant 0 : i32
    %c0_i32_0 = arith.constant 0 : i32
    return %arg0, %c0_i32 : i32, i32
  }
  func.func @transform_2(%arg0: i32) -> (i32, i32) {
    %c0_i32 = arith.constant 0 : i32
    %c0_i32_0 = arith.constant 0 : i32
    %c0_i32_1 = arith.constant 0 : i32
    return %c0_i32, %c0_i32_0 : i32, i32
  }
}

</mosaic_0001>

<bundles_post_ra>
// kernel: tpu_custom_call.1
= control target key start
LH: loop header
LB: loop body
LE: loop exit
PB: predicated region body
PF: predicated region fallthrough
CT: control target
= control target key end

     0   :  { %s123_s0 = inlined_call_operand.vmem [shape: f32[8,16], index: 0, kind: input, shape index: {}]   ;;  %s124_s1 = inlined_call_operand.vmem [shape: s32[8,1], index: 1, kind: input, shape index: {}]   ;;  %s125_s2 = inlined_call_operand.hbm [shape: f32[1,1], index: 2, kind: output, shape index: {}]  }
   0x1   :  { %v19_v0 = vld [vmem:[%s124_s1] sm:$0xff] }
   0x2   :  { %7 = vsyncpa [#allocation3], 0  ;;  %v94_v1 = vmov 0   ;;  %v20_v2 = vlaneseq  ;;  %v18_v4 = vld [vmem:[%s123_s0] sm:$0xff]  ;;  %vm34_vm0 = vcmask 130048   ;;  %vm16_vm2 = vcmask 0  }
   0x3   :  { %67 = vset.pattern.permute.xlu0 %v94_v1  ;;  %v95_v8 = vmov 0.0   ;;  %s96_s1 = smov [#allocation2]   ;;  %s55_s15 = sshll.u32 %s125_s2, 4  ;;  %s56_s15 = int_to_ptr.hbm [resolvable:$true] %s55_s15 }
   0x4   :  { %28 = vperm.xlu0 %67, %v19_v0   ;;  %v21_v3 = vand.u32 127, %v20_v2  ;;  %17 = vst.msk [vmem:[#allocation2] sm:$0x1] %vm16_vm2, %v95_v8  ;;  %s53_s13 = sshll.u32 %s96_s1, 4  ;;  %s54_s13 = int_to_ptr.vmem [resolvable:$true] %s53_s13 }
   0xb   :  { %v38_v15 = vld [vmem:[#allocation2] sm:$0x1] }
  0x76   :  { %v29_v5 = vpop.permute.xlu0 %28 }
  0x77   :  { %vm30_vm1 = vcmp.eq.s32.totalorder %v21_v3, %v29_v5 }
  0x78   :  { %v33_v6 = vsel %vm30_vm1, %v18_v4, 0.0 }
  0x79   :  { %v35_v7 = vsel %vm34_vm0, %v33_v6, 0.0 }
  0x7a   :  { %36 = vadd.xlane.f32.xlu0 %v35_v7 }
  0xed   :  { %v37_v9 = vpop.xlane.xlu0 %36 }
  0xee   :  { %v39_v10 = vrot.slane %v37_v9, 4 }
  0xf0   :  { %v40_v11 = vadd.f32 %v39_v10, %v37_v9 }
  0xf2   :  { %v41_v12 = vrot.slane %v40_v11, 2 }
  0xf4   :  { %v42_v13 = vadd.f32 %v41_v12, %v40_v11 }
  0xf6   :  { %v43_v14 = vrot.slane %v42_v13, 1 }
  0xf8   :  { %v44_v16 = vadd.f32 %v43_v14, %v42_v13 }
  0xfa   :  { %v45_v17 = vadd.f32 %v44_v16, %v38_v15 }
  0xfc   :  { %47 = vst.msk [vmem:[#allocation2] sm:$0x1] %vm16_vm2, %v45_v17 }
  0xfd   :  { %58 = dma.vmem_to_hbm [thread:$0]  %s54_s13, 16, %s56_s15, [#allocation3]  }
  0xfe   :  { %92 = dma.done.wait [#allocation3], 16  }
  0xff   :  { %93 = vsyncadd [#allocation3], 4294967280 }
 0x100   :  { %63 = vsyncpa [#allocation3], 1 }

</bundles_post_ra>
